<compile_context>
chip_gen: v7x
topology: tpu7x:2x2x1
jax: 0.10.0
libtpu: 0.0.40
codegen_flags: <defaults>
</compile_context>

<pallas_src>
import functools
import math

import jax
import jax.numpy as jnp
from jax.experimental import pallas as pl
from jax.experimental.pallas import tpu as pltpu


_TUP = 128          # tuples (outputs) per kernel row
_W = 6 * _TUP       # 768 interleaved lanes per kernel row (multiple of 128)


def _doppler_kernel(x_ref, o_ref, t_ref, *, n_chunks, chunk_rows):
    """One grid step.

    x_ref : (s_blk, 768) block; row r, lane 6k+c  == component c of tuple (base+r)*128+k
    o_ref : (s_blk, 128) block; row r, lane k     == output for tuple (base+r)*128+k
    t_ref : (768, chunk_rows) f32 scratch holding one transposed chunk
    """
    f32 = jnp.float32
    for ci in range(n_chunks):                       # static unroll (<= 8)
        r0 = ci * chunk_rows
        # 1) Transpose the (chunk_rows, 768) chunk into component-on-sublane
        #    form, one 128-lane group at a time (keeps every transpose at
        #    <= (128, 128), well inside vreg/XLU comfort zone).
        for g in range(6):
            xg = x_ref[pl.ds(r0, chunk_rows), pl.ds(g * 128, 128)].astype(f32)
            t_ref[pl.ds(g * 128, 128), :] = xg.T     # (128, chunk_rows)
        # 2) Component planes via sublane-strided reads:
        #    plane[c][k, r] == x[tuple k of chunk-row r, component c]
        p = [t_ref[pl.ds(c, _TUP, stride=6), :] for c in range(6)]
        acc = p[0] * p[3] + p[1] * p[4] + p[2] * p[5]          # (128, chunk_rows) f32
        # 3) Back to tuple-major rows and store lane-dense.
        o_ref[pl.ds(r0, chunk_rows), :] = acc.T.astype(o_ref.dtype)


def _row_multiple(dtype) -> int:
    """Sublane alignment for the kernel-row axis (dtype min-tile aware)."""
    size = jnp.dtype(dtype).itemsize
    if size >= 4:
        return 8
    if size == 2:
        return 16
    return 32


def _choose_block_rows(r_rows, row_mult):
    """Rows per grid step: big blocks for DMA efficiency, but >=4 steps for
    large inputs so the parallel axis can shard across v7x's two cores."""
    for cand in (1024, 512, 256, 128):
        if r_rows >= 4 * cand:
            return cand
    if r_rows >= 128:
        return 128
    return max(row_mult, r_rows)      # tiny input: one exact block


@jax.jit
def us_doppler_conversion(x):
    """x: (..., C) with C >= 6 (components 0..5 used). Returns (..., 1).

    Note: compute is done in float32 (integer inputs are cast; matches the
    float semantics of the PyTorch module for floating dtypes).
    """
    if x.shape[-1] < 6:
        raise ValueError("last axis must have at least 6 components")

    lead_shape = x.shape[:-1]
    n = math.prod(lead_shape)
    if n == 0:
        return jnp.zeros(lead_shape + (1,), x.dtype)

    itemsize = jnp.dtype(x.dtype).itemsize
    c_in = x.shape[-1]

    x2 = x.reshape(n, c_in)                       # free for contiguous input
    if c_in != 6:
        # TODO(synk): extra copy pass; have the producer emit exactly 6 comps.
        x2 = x2[:, :6]

    row_mult = _row_multiple(x.dtype)
    r_rows = pl.cdiv(n, _TUP)
    r_rows = pl.cdiv(r_rows, row_mult) * row_mult
    n_pad = r_rows * _TUP
    if n_pad != n:
        # One copy pass only when N is not already row-aligned.
        x2 = jnp.pad(x2, ((0, n_pad - n), (0, 0)))

    # Free row-major reshape: each 768-lane row = 128 interleaved 6-tuples.
    x_rows = x2.reshape(r_rows, _W)

    s_blk = _choose_block_rows(r_rows, row_mult)
    chunk_rows = min(128, s_blk)
    n_chunks = s_blk // chunk_rows
    grid = pl.cdiv(r_rows, s_blk)                 # final block may be partial

    # VMEM budget: double-buffered in/out blocks + the transpose scratch.
    in_block_bytes = s_blk * _W * itemsize
    out_block_bytes = s_blk * _TUP * itemsize
    scratch_bytes = _W * max(chunk_rows, 128) * 4
    vmem_need = 2 * (in_block_bytes + out_block_bytes) + scratch_bytes
    try:
        vmem_cap = int(pltpu.get_tpu_info().vmem_capacity_bytes)
    except Exception:
        vmem_cap = 64 * 1024 * 1024               # conservative (v7x physical)
    vmem_limit = int(min(max(2 * vmem_need, 16 * 1024 * 1024),
                         (3 * vmem_cap) // 4))

    kernel = functools.partial(_doppler_kernel,
                               n_chunks=n_chunks, chunk_rows=chunk_rows)

    out_rows = pl.pallas_call(
        kernel,
        out_shape=jax.ShapeDtypeStruct((r_rows, _TUP), x.dtype),
        grid_spec=pltpu.PrefetchScalarGridSpec(
            num_scalar_prefetch=0,
            grid=(grid,),
            in_specs=[pl.BlockSpec((s_blk, _W), lambda i: (i, 0))],
            out_specs=pl.BlockSpec((s_blk, _TUP), lambda i: (i, 0)),
            scratch_shapes=[pltpu.VMEM((_W, chunk_rows), jnp.float32)],
        ),
        compiler_params=pltpu.CompilerParams(
            dimension_semantics=("parallel",),
            vmem_limit_bytes=vmem_limit,
        ),
        cost_estimate=pl.CostEstimate(
            flops=5 * n,
            transcendentals=0,
            bytes_accessed=7 * n * itemsize,      # 6 reads + 1 write per tuple
        ),
    )(x_rows)

    out_flat = out_rows.reshape(n_pad)
    if n_pad != n:
        out_flat = out_flat[:n]                   # copy only in the padded case
    return out_flat.reshape(lead_shape + (1,))


def _reference(x):
    # Pure-JAX reference replicating the PyTorch forward exactly.
    return (x[..., 0:1] * x[..., 3:4]
            + x[..., 1:2] * x[..., 4:5]
            + x[..., 2:3] * x[..., 5:6])


if __name__ == "__main__":
    # Small shape consistent with the module: a (..., 6) vector field.
    x = jax.random.normal(jax.random.PRNGKey(0), (2, 4, 16, 6), dtype=jnp.float32)
    out = jax.block_until_ready(us_doppler_conversion(x))
    ref = _reference(x)
    assert out.shape == ref.shape == (2, 4, 16, 1), out.shape
    assert jnp.allclose(out, ref, atol=1e-5, rtol=1e-5), "mismatch vs reference"

    # Row-aligned, multi-block path (zero-copy wrapper: no pad, no tail slice).
    x2 = jax.random.normal(jax.random.PRNGKey(1), (16, 2048, 6), dtype=jnp.float32)
    out2 = jax.block_until_ready(us_doppler_conversion(x2))
    assert jnp.allclose(out2, _reference(x2), atol=1e-5, rtol=1e-5)

    # Non-aligned path (pad + partial final grid block + output tail slice).
    x3 = jax.random.normal(jax.random.PRNGKey(2), (3, 7, 1000, 6), dtype=jnp.float32)
    out3 = jax.block_until_ready(us_doppler_conversion(x3))
    assert jnp.allclose(out3, _reference(x3), atol=1e-5, rtol=1e-5)

    print("KERNEL_OK")
</pallas_src>

<mosaic_0001>
module attributes {stable_mosaic.version = 11 : i64} {
  func.func @_doppler_kernel(%arg0: i32, %arg1: memref<8x768xf32, #tpu.memory_space<vmem>>, %arg2: memref<8x128xf32, #tpu.memory_space<vmem>>, %arg3: memref<768x8xf32, #tpu.memory_space<vmem>>) attributes {dimension_semantics = [#tpu.dimension_semantics<parallel>], iteration_bounds = array<i64: 1>, scalar_prefetch = 0 : i64, scratch_operands = 1 : i64, tpu.core_type = #tpu.core_type<tc>, window_params = [{transform_indices = @transform_0, window_bounds = array<i64: 8, 768>}, {transform_indices = @transform_1, window_bounds = array<i64: 8, 128>}]} {
    %c0 = arith.constant 0 : index
    %c0_0 = arith.constant 0 : index
    %0 = vector.load %arg1[%c0, %c0_0] : memref<8x768xf32, #tpu.memory_space<vmem>>, vector<8x128xf32>
    %1 = tpu.transpose %0, [1, 0] : vector<8x128xf32> -> vector<128x8xf32>
    %c0_1 = arith.constant 0 : index
    %c0_2 = arith.constant 0 : index
    %2 = vector.load %arg3[%c0_1, %c0_2] : memref<768x8xf32, #tpu.memory_space<vmem>>, vector<128x8xf32>
    tpu.vector_store %arg3[%c0_1, %c0_2], %1 {strides = array<i32>} : memref<768x8xf32, #tpu.memory_space<vmem>>, vector<128x8xf32>,
    %c0_3 = arith.constant 0 : index
    %c128 = arith.constant 128 : index
    %3 = vector.load %arg1[%c0_3, %c128] : memref<8x768xf32, #tpu.memory_space<vmem>>, vector<8x128xf32>
    %4 = tpu.transpose %3, [1, 0] : vector<8x128xf32> -> vector<128x8xf32>
    %c128_4 = arith.constant 128 : index
    %c0_5 = arith.constant 0 : index
    %5 = vector.load %arg3[%c128_4, %c0_5] : memref<768x8xf32, #tpu.memory_space<vmem>>, vector<128x8xf32>
    tpu.vector_store %arg3[%c128_4, %c0_5], %4 {strides = array<i32>} : memref<768x8xf32, #tpu.memory_space<vmem>>, vector<128x8xf32>,
    %c0_6 = arith.constant 0 : index
    %c256 = arith.constant 256 : index
    %6 = vector.load %arg1[%c0_6, %c256] : memref<8x768xf32, #tpu.memory_space<vmem>>, vector<8x128xf32>
    %7 = tpu.transpose %6, [1, 0] : vector<8x128xf32> -> vector<128x8xf32>
    %c256_7 = arith.constant 256 : index
    %c0_8 = arith.constant 0 : index
    %8 = vector.load %arg3[%c256_7, %c0_8] : memref<768x8xf32, #tpu.memory_space<vmem>>, vector<128x8xf32>
    tpu.vector_store %arg3[%c256_7, %c0_8], %7 {strides = array<i32>} : memref<768x8xf32, #tpu.memory_space<vmem>>, vector<128x8xf32>,
    %c0_9 = arith.constant 0 : index
    %c384 = arith.constant 384 : index
    %9 = vector.load %arg1[%c0_9, %c384] : memref<8x768xf32, #tpu.memory_space<vmem>>, vector<8x128xf32>
    %10 = tpu.transpose %9, [1, 0] : vector<8x128xf32> -> vector<128x8xf32>
    %c384_10 = arith.constant 384 : index
    %c0_11 = arith.constant 0 : index
    %11 = vector.load %arg3[%c384_10, %c0_11] : memref<768x8xf32, #tpu.memory_space<vmem>>, vector<128x8xf32>
    tpu.vector_store %arg3[%c384_10, %c0_11], %10 {strides = array<i32>} : memref<768x8xf32, #tpu.memory_space<vmem>>, vector<128x8xf32>,
    %c0_12 = arith.constant 0 : index
    %c512 = arith.constant 512 : index
    %12 = vector.load %arg1[%c0_12, %c512] : memref<8x768xf32, #tpu.memory_space<vmem>>, vector<8x128xf32>
    %13 = tpu.transpose %12, [1, 0] : vector<8x128xf32> -> vector<128x8xf32>
    %c512_13 = arith.constant 512 : index
    %c0_14 = arith.constant 0 : index
    %14 = vector.load %arg3[%c512_13, %c0_14] : memref<768x8xf32, #tpu.memory_space<vmem>>, vector<128x8xf32>
    tpu.vector_store %arg3[%c512_13, %c0_14], %13 {strides = array<i32>} : memref<768x8xf32, #tpu.memory_space<vmem>>, vector<128x8xf32>,
    %c0_15 = arith.constant 0 : index
    %c640 = arith.constant 640 : index
    %15 = vector.load %arg1[%c0_15, %c640] : memref<8x768xf32, #tpu.memory_space<vmem>>, vector<8x128xf32>
    %16 = tpu.transpose %15, [1, 0] : vector<8x128xf32> -> vector<128x8xf32>
    %c640_16 = arith.constant 640 : index
    %c0_17 = arith.constant 0 : index
    %17 = vector.load %arg3[%c640_16, %c0_17] : memref<768x8xf32, #tpu.memory_space<vmem>>, vector<128x8xf32>
    tpu.vector_store %arg3[%c640_16, %c0_17], %16 {strides = array<i32>} : memref<768x8xf32, #tpu.memory_space<vmem>>, vector<128x8xf32>,
    %c0_18 = arith.constant 0 : index
    %c0_19 = arith.constant 0 : index
    %18 = tpu.strided_load %arg3[%c0_18, %c0_19] {strides = array<i32: 6, 1>} : memref<768x8xf32, #tpu.memory_space<vmem>>, vector<128x8xf32>
    %c1 = arith.constant 1 : index
    %c0_20 = arith.constant 0 : index
    %19 = tpu.strided_load %arg3[%c1, %c0_20] {strides = array<i32: 6, 1>} : memref<768x8xf32, #tpu.memory_space<vmem>>, vector<128x8xf32>
    %c2 = arith.constant 2 : index
    %c0_21 = arith.constant 0 : index
    %20 = tpu.strided_load %arg3[%c2, %c0_21] {strides = array<i32: 6, 1>} : memref<768x8xf32, #tpu.memory_space<vmem>>, vector<128x8xf32>
    %c3 = arith.constant 3 : index
    %c0_22 = arith.constant 0 : index
    %21 = tpu.strided_load %arg3[%c3, %c0_22] {strides = array<i32: 6, 1>} : memref<768x8xf32, #tpu.memory_space<vmem>>, vector<128x8xf32>
    %c4 = arith.constant 4 : index
    %c0_23 = arith.constant 0 : index
    %22 = tpu.strided_load %arg3[%c4, %c0_23] {strides = array<i32: 6, 1>} : memref<768x8xf32, #tpu.memory_space<vmem>>, vector<128x8xf32>
    %c5 = arith.constant 5 : index
    %c0_24 = arith.constant 0 : index
    %23 = tpu.strided_load %arg3[%c5, %c0_24] {strides = array<i32: 6, 1>} : memref<768x8xf32, #tpu.memory_space<vmem>>, vector<128x8xf32>
    %24 = arith.mulf %18, %21 : vector<128x8xf32>
    %25 = arith.mulf %19, %22 : vector<128x8xf32>
    %26 = arith.addf %24, %25 : vector<128x8xf32>
    %27 = arith.mulf %20, %23 : vector<128x8xf32>
    %28 = arith.addf %26, %27 : vector<128x8xf32>
    %29 = tpu.transpose %28, [1, 0] : vector<128x8xf32> -> vector<8x128xf32>
    %c0_25 = arith.constant 0 : index
    %c0_26 = arith.constant 0 : index
    %30 = vector.load %arg2[%c0_25, %c0_26] : memref<8x128xf32, #tpu.memory_space<vmem>>, vector<8x128xf32>
    tpu.vector_store %arg2[%c0_25, %c0_26], %29 {strides = array<i32>} : memref<8x128xf32, #tpu.memory_space<vmem>>, vector<8x128xf32>,
    return
  }
  func.func @transform_0(%arg0: i32) -> (i32, i32) {
    %c0_i32 = arith.constant 0 : i32
    %c0_i32_0 = arith.constant 0 : i32
    return %arg0, %c0_i32 : i32, i32
  }
  func.func @transform_1(%arg0: i32) -> (i32, i32) {
    %c0_i32 = arith.constant 0 : i32
    %c0_i32_0 = arith.constant 0 : i32
    return %arg0, %c0_i32 : i32, i32
  }
}

</mosaic_0001>

<bundles_post_ra>
// kernel: us_doppler_conversion.1
= control target key start
LH: loop header
LB: loop body
LE: loop exit
PB: predicated region body
PF: predicated region fallthrough
CT: control target
= control target key end

     0   :  { %vm41_vm0 = vcmask 64512   ;;  %s739_s0 = inlined_call_operand.vmem [shape: f32[8,768], index: 0, kind: input, shape index: {}]   ;;  %s740_s1 = inlined_call_operand.vmem [shape: f32[8,128], index: 1, kind: output, shape index: {}]  }
   0x1   :  { %v107_v0 = vld [vmem:[%s739_s0 + $0x10] sm:$0xff]  ;;  %v8_v1 = vld [vmem:[%s739_s0] sm:$0xff]  ;;  %v58_v2 = vld [vmem:[%s739_s0 + $0x8] sm:$0xff] }
   0x2   :  { %108 = vxpose.xlu1.b32.start.end [1/1] (short) %v107_v0, 128  ;;  %9 = vxpose.xlu0.b32.start.end [1/1] (short) %v8_v1, 128  ;;  %v156_v3 = vld [vmem:[%s739_s0 + $0x18] sm:$0xff]  ;;  %v205_v4 = vld [vmem:[%s739_s0 + $0x20] sm:$0xff]  ;;  %v254_v5 = vld [vmem:[%s739_s0 + $0x28] sm:$0xff] }
  0x3f   :  { %59 = vxpose.xlu0.b32.start.end [1/1] (short) %v58_v2, 128  ;;  %157 = vxpose.xlu1.b32.start.end [1/1] (short) %v156_v3, 128 }
  0x7c   :  { %206 = vxpose.xlu0.b32.start.end [1/1] (short) %v205_v4, 128  ;;  %255 = vxpose.xlu1.b32.start.end [1/1] (short) %v254_v5, 128 }
  0x82   :  { %v124_v6 = vpop.trf.xlu1  ;;  %v25_v7 = vpop.trf.xlu0 }
  0x83   :  { %140 = vst.msk [vmem:[#allocation2 + $0x100] sm:$0xff] %vm41_vm0, %v124_v6  ;;  %42 = vst.msk [vmem:[#allocation2] sm:$0xff] %vm41_vm0, %v25_v7 }
  0x86   :  { %v125_v8 = vpop.trf.xlu1  ;;  %v26_v9 = vpop.trf.xlu0 }
  0x87   :  { %141 = vst.msk [vmem:[#allocation2 + $0x108] sm:$0xff] %vm41_vm0, %v125_v8  ;;  %43 = vst.msk [vmem:[#allocation2 + $0x8] sm:$0xff] %vm41_vm0, %v26_v9 }
  0x8a   :  { %v126_v10 = vpop.trf.xlu1  ;;  %v27_v11 = vpop.trf.xlu0 }
  0x8b   :  { %142 = vst.msk [vmem:[#allocation2 + $0x110] sm:$0xff] %vm41_vm0, %v126_v10  ;;  %44 = vst.msk [vmem:[#allocation2 + $0x10] sm:$0xff] %vm41_vm0, %v27_v11 }
  0x8e   :  { %v127_v12 = vpop.trf.xlu1  ;;  %v28_v13 = vpop.trf.xlu0 }
  0x8f   :  { %143 = vst.msk [vmem:[#allocation2 + $0x118] sm:$0xff] %vm41_vm0, %v127_v12  ;;  %45 = vst.msk [vmem:[#allocation2 + $0x18] sm:$0xff] %vm41_vm0, %v28_v13 }
  0x92   :  { %v128_v14 = vpop.trf.xlu1  ;;  %v29_v15 = vpop.trf.xlu0 }
  0x93   :  { %144 = vst.msk [vmem:[#allocation2 + $0x120] sm:$0xff] %vm41_vm0, %v128_v14  ;;  %46 = vst.msk [vmem:[#allocation2 + $0x20] sm:$0xff] %vm41_vm0, %v29_v15 }
  0x96   :  { %v129_v16 = vpop.trf.xlu1  ;;  %v30_v17 = vpop.trf.xlu0 }
  0x97   :  { %145 = vst.msk [vmem:[#allocation2 + $0x128] sm:$0xff] %vm41_vm0, %v129_v16  ;;  %47 = vst.msk [vmem:[#allocation2 + $0x28] sm:$0xff] %vm41_vm0, %v30_v17 }
  0x9a   :  { %v130_v18 = vpop.trf.xlu1  ;;  %v31_v19 = vpop.trf.xlu0 }
  0x9b   :  { %146 = vst.msk [vmem:[#allocation2 + $0x130] sm:$0xff] %vm41_vm0, %v130_v18  ;;  %48 = vst.msk [vmem:[#allocation2 + $0x30] sm:$0xff] %vm41_vm0, %v31_v19 }
  0x9e   :  { %v131_v20 = vpop.trf.xlu1  ;;  %v32_v21 = vpop.trf.xlu0  ;;  %v303_v28 = vld [vmem:[#allocation2] ss:$6 sm:$0xff]  ;;  %v335_v29 = vld [vmem:[#allocation2 + $0x1] ss:$6 sm:$0xff] }
  0x9f   :  { %147 = vst.msk [vmem:[#allocation2 + $0x138] sm:$0xff] %vm41_vm0, %v131_v20  ;;  %49 = vst.msk [vmem:[#allocation2 + $0x38] sm:$0xff] %vm41_vm0, %v32_v21  ;;  %v399_v30 = vld [vmem:[#allocation2 + $0x3] ss:$6 sm:$0xff]  ;;  %v431_v31 = vld [vmem:[#allocation2 + $0x4] ss:$6 sm:$0xff] }
  0xa0   :  { %v494_v34 = vmul.f32 %v399_v30, %v303_v28  ;;  %v510_v35 = vmul.f32 %v431_v31, %v335_v29  ;;  %v367_v38 = vld [vmem:[#allocation2 + $0x2] ss:$6 sm:$0xff]  ;;  %v463_v39 = vld [vmem:[#allocation2 + $0x5] ss:$6 sm:$0xff] }
  0xa1   :  { %v542_v41 = vmul.f32 %v463_v39, %v367_v38 }
  0xa2   :  { %v132_v22 = vpop.trf.xlu1  ;;  %v33_v23 = vpop.trf.xlu0  ;;  %v526_v40 = vadd.f32 %v510_v35, %v494_v34 }
  0xa3   :  { %148 = vst.msk [vmem:[#allocation2 + $0x140] sm:$0xff] %vm41_vm0, %v132_v22  ;;  %50 = vst.msk [vmem:[#allocation2 + $0x40] sm:$0xff] %vm41_vm0, %v33_v23 }
  0xa4   :  { %v558_v47 = vadd.f32 %v542_v41, %v526_v40 }
  0xa6   :  { %v133_v24 = vpop.trf.xlu1  ;;  %v34_v25 = vpop.trf.xlu0 }
  0xa7   :  { %149 = vst.msk [vmem:[#allocation2 + $0x148] sm:$0xff] %vm41_vm0, %v133_v24  ;;  %51 = vst.msk [vmem:[#allocation2 + $0x48] sm:$0xff] %vm41_vm0, %v34_v25 }
  0xaa   :  { %v134_v26 = vpop.trf.xlu1  ;;  %v35_v27 = vpop.trf.xlu0 }
  0xab   :  { %150 = vst.msk [vmem:[#allocation2 + $0x150] sm:$0xff] %vm41_vm0, %v134_v26  ;;  %52 = vst.msk [vmem:[#allocation2 + $0x50] sm:$0xff] %vm41_vm0, %v35_v27 }
  0xae   :  { %v135_v32 = vpop.trf.xlu1  ;;  %v36_v33 = vpop.trf.xlu0 }
  0xaf   :  { %151 = vst.msk [vmem:[#allocation2 + $0x158] sm:$0xff] %vm41_vm0, %v135_v32  ;;  %53 = vst.msk [vmem:[#allocation2 + $0x58] sm:$0xff] %vm41_vm0, %v36_v33 }
  0xb2   :  { %v136_v36 = vpop.trf.xlu1  ;;  %v37_v37 = vpop.trf.xlu0 }
  0xb3   :  { %152 = vst.msk [vmem:[#allocation2 + $0x160] sm:$0xff] %vm41_vm0, %v136_v36  ;;  %54 = vst.msk [vmem:[#allocation2 + $0x60] sm:$0xff] %vm41_vm0, %v37_v37 }
  0xb6   :  { %v137_v42 = vpop.trf.xlu1  ;;  %v38_v43 = vpop.trf.xlu0  ;;  %v305_v44 = vld [vmem:[#allocation2 + $0x30] ss:$6 sm:$0xff]  ;;  %v337_v45 = vld [vmem:[#allocation2 + $0x31] ss:$6 sm:$0xff] }
  0xb7   :  { %v369_v46 = vld [vmem:[#allocation2 + $0x32] ss:$6 sm:$0xff]  ;;  %153 = vst.msk [vmem:[#allocation2 + $0x168] sm:$0xff] %vm41_vm0, %v137_v42  ;;  %55 = vst.msk [vmem:[#allocation2 + $0x68] sm:$0xff] %vm41_vm0, %v38_v43  ;;  %v401_v48 = vld [vmem:[#allocation2 + $0x33] ss:$6 sm:$0xff] }
  0xb8   :  { %v433_v49 = vld [vmem:[#allocation2 + $0x34] ss:$6 sm:$0xff]  ;;  %v465_v50 = vld [vmem:[#allocation2 + $0x35] ss:$6 sm:$0xff]  ;;  %v495_v51 = vmul.f32 %v401_v48, %v305_v44 }
  0xb9   :  { %v511_v52 = vmul.f32 %v433_v49, %v337_v45  ;;  %574 = vxpose.xlu0.b32.start [1/16] (narrow) %v558_v47, 8  ;;  %v543_v56 = vmul.f32 %v465_v50, %v369_v46 }
  0xba   :  { %v138_v53 = vpop.trf.xlu1  ;;  %v39_v54 = vpop.trf.xlu0 }
  0xbb   :  { %v527_v55 = vadd.f32 %v511_v52, %v495_v51  ;;  %154 = vst.msk [vmem:[#allocation2 + $0x170] sm:$0xff] %vm41_vm0, %v138_v53  ;;  %56 = vst.msk [vmem:[#allocation2 + $0x70] sm:$0xff] %vm41_vm0, %v39_v54 }
  0xbd   :  { %v559_v57 = vadd.f32 %v543_v56, %v527_v55 }
  0xbe   :  { %v139_v58 = vpop.trf.xlu1  ;;  %v40_v59 = vpop.trf.xlu0 }
  0xbf   :  { %575 = vxpose.xlu0.b32.cont [2/16] (narrow) %v559_v57, 8  ;;  %155 = vst.msk [vmem:[#allocation2 + $0x178] sm:$0xff] %vm41_vm0, %v139_v58  ;;  %57 = vst.msk [vmem:[#allocation2 + $0x78] sm:$0xff] %vm41_vm0, %v40_v59 }
  0xc2   :  { %v173_v60 = vpop.trf.xlu1  ;;  %v75_v61 = vpop.trf.xlu0 }
  0xc3   :  { %189 = vst.msk [vmem:[#allocation2 + $0x180] sm:$0xff] %vm41_vm0, %v173_v60  ;;  %91 = vst.msk [vmem:[#allocation2 + $0x80] sm:$0xff] %vm41_vm0, %v75_v61 }
  0xc6   :  { %v174_v62 = vpop.trf.xlu1  ;;  %v76_v63 = vpop.trf.xlu0 }
  0xc7   :  { %190 = vst.msk [vmem:[#allocation2 + $0x188] sm:$0xff] %vm41_vm0, %v174_v62  ;;  %92 = vst.msk [vmem:[#allocation2 + $0x88] sm:$0xff] %vm41_vm0, %v76_v63  ;;  %v315_v63 = vld [vmem:[#allocation2 + $0x120] ss:$6 sm:$0xff] }
  0xca   :  { %v175_v0 = vpop.trf.xlu1  ;;  %v77_v1 = vpop.trf.xlu0 }
  0xcb   :  { %191 = vst.msk [vmem:[#allocation2 + $0x190] sm:$0xff] %vm41_vm0, %v175_v0  ;;  %93 = vst.msk [vmem:[#allocation2 + $0x90] sm:$0xff] %vm41_vm0, %v77_v1  ;;  %v347_v0 = vld [vmem:[#allocation2 + $0x121] ss:$6 sm:$0xff] }
  0xcc   :  { %v411_v1 = vld [vmem:[#allocation2 + $0x123] ss:$6 sm:$0xff] }
  0xce   :  { %v176_v2 = vpop.trf.xlu1  ;;  %v78_v3 = vpop.trf.xlu0  ;;  %v307_v4 = vld [vmem:[#allocation2 + $0x60] ss:$6 sm:$0xff]  ;;  %v339_v5 = vld [vmem:[#allocation2 + $0x61] ss:$6 sm:$0xff] }
  0xcf   :  { %v371_v6 = vld [vmem:[#allocation2 + $0x62] ss:$6 sm:$0xff]  ;;  %192 = vst.msk [vmem:[#allocation2 + $0x198] sm:$0xff] %vm41_vm0, %v176_v2  ;;  %94 = vst.msk [vmem:[#allocation2 + $0x98] sm:$0xff] %vm41_vm0, %v78_v3  ;;  %v403_v7 = vld [vmem:[#allocation2 + $0x63] ss:$6 sm:$0xff] }
  0xd0   :  { %v435_v8 = vld [vmem:[#allocation2 + $0x64] ss:$6 sm:$0xff]  ;;  %v467_v9 = vld [vmem:[#allocation2 + $0x65] ss:$6 sm:$0xff]  ;;  %v496_v10 = vmul.f32 %v403_v7, %v307_v4 }
  0xd1   :  { %v512_v11 = vmul.f32 %v435_v8, %v339_v5  ;;  %v544_v15 = vmul.f32 %v467_v9, %v371_v6  ;;  %v443_v2 = vld [vmem:[#allocation2 + $0x124] ss:$6 sm:$0xff] }
  0xd2   :  { %v177_v12 = vpop.trf.xlu1  ;;  %v79_v13 = vpop.trf.xlu0 }
  0xd3   :  { %v528_v14 = vadd.f32 %v512_v11, %v496_v10  ;;  %193 = vst.msk [vmem:[#allocation2 + $0x1a0] sm:$0xff] %vm41_vm0, %v177_v12  ;;  %95 = vst.msk [vmem:[#allocation2 + $0xa0] sm:$0xff] %vm41_vm0, %v79_v13  ;;  %v500_v13 = vmul.f32 %v411_v1, %v315_v63 }
  0xd5   :  { %v560_v16 = vadd.f32 %v544_v15, %v528_v14  ;;  %v516_v14 = vmul.f32 %v443_v2, %v347_v0  ;;  %v317_v15 = vld [vmem:[#allocation2 + $0x150] ss:$6 sm:$0xff] }
  0xd6   :  { %v178_v17 = vpop.trf.xlu1  ;;  %v80_v18 = vpop.trf.xlu0 }
  0xd7   :  { %576 = vxpose.xlu0.b32.cont [3/16] (narrow) %v560_v16, 8  ;;  %194 = vst.msk [vmem:[#allocation2 + $0x1a8] sm:$0xff] %vm41_vm0, %v178_v17  ;;  %96 = vst.msk [vmem:[#allocation2 + $0xa8] sm:$0xff] %vm41_vm0, %v80_v18  ;;  %v349_v16 = vld [vmem:[#allocation2 + $0x151] ss:$6 sm:$0xff] }
  0xd8   :  { %v413_v17 = vld [vmem:[#allocation2 + $0x153] ss:$6 sm:$0xff]  ;;  %v445_v18 = vld [vmem:[#allocation2 + $0x154] ss:$6 sm:$0xff] }
  0xda   :  { %v179_v19 = vpop.trf.xlu1  ;;  %v81_v20 = vpop.trf.xlu0 }
  0xdb   :  { %195 = vst.msk [vmem:[#allocation2 + $0x1b0] sm:$0xff] %vm41_vm0, %v179_v19  ;;  %97 = vst.msk [vmem:[#allocation2 + $0xb0] sm:$0xff] %vm41_vm0, %v81_v20 }
  0xde   :  { %v180_v21 = vpop.trf.xlu1  ;;  %v82_v22 = vpop.trf.xlu0 }
  0xdf   :  { %196 = vst.msk [vmem:[#allocation2 + $0x1b8] sm:$0xff] %vm41_vm0, %v180_v21  ;;  %98 = vst.msk [vmem:[#allocation2 + $0xb8] sm:$0xff] %vm41_vm0, %v82_v22 }
  0xe2   :  { %v181_v23 = vpop.trf.xlu1  ;;  %v83_v24 = vpop.trf.xlu0 }
  0xe3   :  { %197 = vst.msk [vmem:[#allocation2 + $0x1c0] sm:$0xff] %vm41_vm0, %v181_v23  ;;  %99 = vst.msk [vmem:[#allocation2 + $0xc0] sm:$0xff] %vm41_vm0, %v83_v24  ;;  %v379_v23 = vld [vmem:[#allocation2 + $0x122] ss:$6 sm:$0xff]  ;;  %v475_v24 = vld [vmem:[#allocation2 + $0x125] ss:$6 sm:$0xff] }
  0xe6   :  { %v182_v25 = vpop.trf.xlu1  ;;  %v84_v26 = vpop.trf.xlu0  ;;  %v309_v27 = vld [vmem:[#allocation2 + $0x90] ss:$6 sm:$0xff]  ;;  %v341_v28 = vld [vmem:[#allocation2 + $0x91] ss:$6 sm:$0xff] }
  0xe7   :  { %v373_v29 = vld [vmem:[#allocation2 + $0x92] ss:$6 sm:$0xff]  ;;  %198 = vst.msk [vmem:[#allocation2 + $0x1c8] sm:$0xff] %vm41_vm0, %v182_v25  ;;  %100 = vst.msk [vmem:[#allocation2 + $0xc8] sm:$0xff] %vm41_vm0, %v84_v26  ;;  %v405_v30 = vld [vmem:[#allocation2 + $0x93] ss:$6 sm:$0xff]  ;;  %v532_v26 = vadd.f32 %v516_v14, %v500_v13 }
  0xe8   :  { %v437_v31 = vld [vmem:[#allocation2 + $0x94] ss:$6 sm:$0xff]  ;;  %v469_v32 = vld [vmem:[#allocation2 + $0x95] ss:$6 sm:$0xff]  ;;  %v497_v33 = vmul.f32 %v405_v30, %v309_v27  ;;  %v501_v27 = vmul.f32 %v413_v17, %v317_v15 }
  0xe9   :  { %v513_v34 = vmul.f32 %v437_v31, %v341_v28  ;;  %v545_v38 = vmul.f32 %v469_v32, %v373_v29  ;;  %v517_v28 = vmul.f32 %v445_v18, %v349_v16  ;;  %v319_v29 = vld [vmem:[#allocation2 + $0x180] ss:$6 sm:$0xff]  ;;  %v351_v30 = vld [vmem:[#allocation2 + $0x181] ss:$6 sm:$0xff] }
  0xea   :  { %v183_v35 = vpop.trf.xlu1  ;;  %v85_v36 = vpop.trf.xlu0  ;;  %v415_v31 = vld [vmem:[#allocation2 + $0x183] ss:$6 sm:$0xff]  ;;  %v447_v32 = vld [vmem:[#allocation2 + $0x184] ss:$6 sm:$0xff] }
  0xeb   :  { %v529_v37 = vadd.f32 %v513_v34, %v497_v33  ;;  %199 = vst.msk [vmem:[#allocation2 + $0x1d0] sm:$0xff] %vm41_vm0, %v183_v35  ;;  %101 = vst.msk [vmem:[#allocation2 + $0xd0] sm:$0xff] %vm41_vm0, %v85_v36  ;;  %v548_v35 = vmul.f32 %v475_v24, %v379_v23  ;;  %v381_v36 = vld [vmem:[#allocation2 + $0x152] ss:$6 sm:$0xff] }
  0xed   :  { %v561_v39 = vadd.f32 %v545_v38, %v529_v37  ;;  %v477_v37 = vld [vmem:[#allocation2 + $0x155] ss:$6 sm:$0xff]  ;;  %v564_v38 = vadd.f32 %v548_v35, %v532_v26 }
  0xee   :  { %v184_v40 = vpop.trf.xlu1  ;;  %v86_v41 = vpop.trf.xlu0 }
  0xef   :  { %577 = vxpose.xlu0.b32.cont [4/16] (narrow) %v561_v39, 8  ;;  %200 = vst.msk [vmem:[#allocation2 + $0x1d8] sm:$0xff] %vm41_vm0, %v184_v40  ;;  %102 = vst.msk [vmem:[#allocation2 + $0xd8] sm:$0xff] %vm41_vm0, %v86_v41  ;;  %v533_v39 = vadd.f32 %v517_v28, %v501_v27  ;;  %v502_v40 = vmul.f32 %v415_v31, %v319_v29  ;;  %v518_v41 = vmul.f32 %v447_v32, %v351_v30 }
  0xf2   :  { %v185_v42 = vpop.trf.xlu1  ;;  %v87_v43 = vpop.trf.xlu0 }
  0xf3   :  { %201 = vst.msk [vmem:[#allocation2 + $0x1e0] sm:$0xff] %vm41_vm0, %v185_v42  ;;  %103 = vst.msk [vmem:[#allocation2 + $0xe0] sm:$0xff] %vm41_vm0, %v87_v43 }
  0xf6   :  { %v186_v44 = vpop.trf.xlu1  ;;  %v88_v45 = vpop.trf.xlu0  ;;  %v321_v42 = vld [vmem:[#allocation2 + $0x1b0] ss:$6 sm:$0xff]  ;;  %v353_v43 = vld [vmem:[#allocation2 + $0x1b1] ss:$6 sm:$0xff] }
  0xf7   :  { %202 = vst.msk [vmem:[#allocation2 + $0x1e8] sm:$0xff] %vm41_vm0, %v186_v44  ;;  %104 = vst.msk [vmem:[#allocation2 + $0xe8] sm:$0xff] %vm41_vm0, %v88_v45  ;;  %v417_v44 = vld [vmem:[#allocation2 + $0x1b3] ss:$6 sm:$0xff]  ;;  %v449_v45 = vld [vmem:[#allocation2 + $0x1b4] ss:$6 sm:$0xff] }
  0xf8   :  { %v481_v63 = vld [vmem:[#allocation2 + $0x1b5] ss:$6 sm:$0xff] }
  0xfa   :  { %v187_v46 = vpop.trf.xlu1  ;;  %v89_v47 = vpop.trf.xlu0 }
  0xfb   :  { %203 = vst.msk [vmem:[#allocation2 + $0x1f0] sm:$0xff] %vm41_vm0, %v187_v46  ;;  %105 = vst.msk [vmem:[#allocation2 + $0xf0] sm:$0xff] %vm41_vm0, %v89_v47 }
  0xfe   :  { %v188_v48 = vpop.trf.xlu1  ;;  %v90_v49 = vpop.trf.xlu0  ;;  %v311_v50 = vld [vmem:[#allocation2 + $0xc0] ss:$6 sm:$0xff]  ;;  %v343_v51 = vld [vmem:[#allocation2 + $0xc1] ss:$6 sm:$0xff] }
  0xff   :  { %v375_v52 = vld [vmem:[#allocation2 + $0xc2] ss:$6 sm:$0xff]  ;;  %204 = vst.msk [vmem:[#allocation2 + $0x1f8] sm:$0xff] %vm41_vm0, %v188_v48  ;;  %106 = vst.msk [vmem:[#allocation2 + $0xf8] sm:$0xff] %vm41_vm0, %v90_v49  ;;  %v407_v53 = vld [vmem:[#allocation2 + $0xc3] ss:$6 sm:$0xff]  ;;  %v549_v48 = vmul.f32 %v477_v37, %v381_v36 }
 0x100   :  { %v439_v54 = vld [vmem:[#allocation2 + $0xc4] ss:$6 sm:$0xff]  ;;  %v471_v55 = vld [vmem:[#allocation2 + $0xc5] ss:$6 sm:$0xff]  ;;  %v498_v56 = vmul.f32 %v407_v53, %v311_v50  ;;  %v503_v53 = vmul.f32 %v417_v44, %v321_v42 }
 0x101   :  { %v514_v57 = vmul.f32 %v439_v54, %v343_v51  ;;  %v546_v61 = vmul.f32 %v471_v55, %v375_v52  ;;  %v383_v49 = vld [vmem:[#allocation2 + $0x182] ss:$6 sm:$0xff]  ;;  %v479_v50 = vld [vmem:[#allocation2 + $0x185] ss:$6 sm:$0xff]  ;;  %v565_v51 = vadd.f32 %v549_v48, %v533_v39  ;;  %v534_v52 = vadd.f32 %v518_v41, %v502_v40 }
 0x102   :  { %v271_v58 = vpop.trf.xlu1  ;;  %v222_v59 = vpop.trf.xlu0  ;;  %v519_v54 = vmul.f32 %v449_v45, %v353_v43 }
 0x103   :  { %v530_v60 = vadd.f32 %v514_v57, %v498_v56  ;;  %287 = vst.msk [vmem:[#allocation2 + $0x280] sm:$0xff] %vm41_vm0, %v271_v58  ;;  %238 = vst.msk [vmem:[#allocation2 + $0x200] sm:$0xff] %vm41_vm0, %v222_v59 }
 0x104   :  { %v535_v1 = vadd.f32 %v519_v54, %v503_v53 }
 0x105   :  { %v562_v62 = vadd.f32 %v546_v61, %v530_v60  ;;  %v550_v61 = vmul.f32 %v479_v50, %v383_v49 }
 0x106   :  { %v272_v3 = vpop.trf.xlu1  ;;  %v223_v4 = vpop.trf.xlu0  ;;  %v313_v5 = vld [vmem:[#allocation2 + $0xf0] ss:$6 sm:$0xff]  ;;  %v345_v6 = vld [vmem:[#allocation2 + $0xf1] ss:$6 sm:$0xff] }
 0x107   :  { %578 = vxpose.xlu0.b32.cont [5/16] (narrow) %v562_v62, 8  ;;  %288 = vst.msk [vmem:[#allocation2 + $0x288] sm:$0xff] %vm41_vm0, %v272_v3  ;;  %239 = vst.msk [vmem:[#allocation2 + $0x208] sm:$0xff] %vm41_vm0, %v223_v4  ;;  %v377_v7 = vld [vmem:[#allocation2 + $0xf2] ss:$6 sm:$0xff]  ;;  %v566_v0 = vadd.f32 %v550_v61, %v534_v52 }
 0x108   :  { %v409_v8 = vld [vmem:[#allocation2 + $0xf3] ss:$6 sm:$0xff]  ;;  %v441_v9 = vld [vmem:[#allocation2 + $0xf4] ss:$6 sm:$0xff] }
 0x109   :  { %v473_v10 = vld [vmem:[#allocation2 + $0xf5] ss:$6 sm:$0xff]  ;;  %v499_v11 = vmul.f32 %v409_v8, %v313_v5  ;;  %v515_v12 = vmul.f32 %v441_v9, %v345_v6  ;;  %v385_v62 = vld [vmem:[#allocation2 + $0x1b2] ss:$6 sm:$0xff] }
 0x10a   :  { %v273_v19 = vpop.trf.xlu1  ;;  %v224_v20 = vpop.trf.xlu0  ;;  %v547_v22 = vmul.f32 %v473_v10, %v377_v7  ;;  %v551_v6 = vmul.f32 %v481_v63, %v385_v62 }
 0x10b   :  { %v531_v21 = vadd.f32 %v515_v12, %v499_v11  ;;  %289 = vst.msk [vmem:[#allocation2 + $0x290] sm:$0xff] %vm41_vm0, %v273_v19  ;;  %240 = vst.msk [vmem:[#allocation2 + $0x210] sm:$0xff] %vm41_vm0, %v224_v20 }
 0x10c   :  { %v567_v9 = vadd.f32 %v551_v6, %v535_v1 }
 0x10d   :  { %v563_v25 = vadd.f32 %v547_v22, %v531_v21 }
 0x10e   :  { %v274_v33 = vpop.trf.xlu1  ;;  %v225_v34 = vpop.trf.xlu0  ;;  %v323_v55 = vld [vmem:[#allocation2 + $0x1e0] ss:$6 sm:$0xff]  ;;  %v355_v56 = vld [vmem:[#allocation2 + $0x1e1] ss:$6 sm:$0xff] }
 0x10f   :  { %579 = vxpose.xlu0.b32.cont [6/16] (narrow) %v563_v25, 8  ;;  %290 = vst.msk [vmem:[#allocation2 + $0x298] sm:$0xff] %vm41_vm0, %v274_v33  ;;  %241 = vst.msk [vmem:[#allocation2 + $0x218] sm:$0xff] %vm41_vm0, %v225_v34  ;;  %v419_v57 = vld [vmem:[#allocation2 + $0x1e3] ss:$6 sm:$0xff] }
 0x110   :  { %v451_v58 = vld [vmem:[#allocation2 + $0x1e4] ss:$6 sm:$0xff]  ;;  %v504_v2 = vmul.f32 %v419_v57, %v323_v55  ;;  %v483_v8 = vld [vmem:[#allocation2 + $0x1e5] ss:$6 sm:$0xff] }
 0x111   :  { %v520_v3 = vmul.f32 %v451_v58, %v355_v56  ;;  %v387_v7 = vld [vmem:[#allocation2 + $0x1e2] ss:$6 sm:$0xff] }
 0x112   :  { %v275_v46 = vpop.trf.xlu1  ;;  %v226_v47 = vpop.trf.xlu0  ;;  %v552_v13 = vmul.f32 %v483_v8, %v387_v7 }
 0x113   :  { %580 = vxpose.xlu0.b32.cont [7/16] (narrow) %v564_v38, 8  ;;  %291 = vst.msk [vmem:[#allocation2 + $0x2a0] sm:$0xff] %vm41_vm0, %v275_v46  ;;  %242 = vst.msk [vmem:[#allocation2 + $0x220] sm:$0xff] %vm41_vm0, %v226_v47  ;;  %v536_v10 = vadd.f32 %v520_v3, %v504_v2 }
 0x115   :  { %v568_v14 = vadd.f32 %v552_v13, %v536_v10 }
 0x116   :  { %v276_v59 = vpop.trf.xlu1  ;;  %v227_v60 = vpop.trf.xlu0 }
 0x117   :  { %581 = vxpose.xlu0.b32.cont [8/16] (narrow) %v565_v51, 8  ;;  %292 = vst.msk [vmem:[#allocation2 + $0x2a8] sm:$0xff] %vm41_vm0, %v276_v59  ;;  %243 = vst.msk [vmem:[#allocation2 + $0x228] sm:$0xff] %vm41_vm0, %v227_v60 }
 0x11a   :  { %v277_v4 = vpop.trf.xlu1  ;;  %v228_v5 = vpop.trf.xlu0 }
 0x11b   :  { %582 = vxpose.xlu0.b32.cont [9/16] (narrow) %v566_v0, 8  ;;  %293 = vst.msk [vmem:[#allocation2 + $0x2b0] sm:$0xff] %vm41_vm0, %v277_v4  ;;  %244 = vst.msk [vmem:[#allocation2 + $0x230] sm:$0xff] %vm41_vm0, %v228_v5 }
 0x11e   :  { %v278_v11 = vpop.trf.xlu1  ;;  %v229_v12 = vpop.trf.xlu0 }
 0x11f   :  { %583 = vxpose.xlu0.b32.cont [10/16] (narrow) %v567_v9, 8  ;;  %294 = vst.msk [vmem:[#allocation2 + $0x2b8] sm:$0xff] %vm41_vm0, %v278_v11  ;;  %245 = vst.msk [vmem:[#allocation2 + $0x238] sm:$0xff] %vm41_vm0, %v229_v12 }
 0x122   :  { %v279_v15 = vpop.trf.xlu1  ;;  %v230_v16 = vpop.trf.xlu0 }
 0x123   :  { %584 = vxpose.xlu0.b32.cont [11/16] (narrow) %v568_v14, 8  ;;  %295 = vst.msk [vmem:[#allocation2 + $0x2c0] sm:$0xff] %vm41_vm0, %v279_v15  ;;  %246 = vst.msk [vmem:[#allocation2 + $0x240] sm:$0xff] %vm41_vm0, %v230_v16 }
 0x126   :  { %v280_v17 = vpop.trf.xlu1  ;;  %v231_v18 = vpop.trf.xlu0  ;;  %v325_v19 = vld [vmem:[#allocation2 + $0x210] ss:$6 sm:$0xff]  ;;  %v357_v20 = vld [vmem:[#allocation2 + $0x211] ss:$6 sm:$0xff] }
 0x127   :  { %v389_v21 = vld [vmem:[#allocation2 + $0x212] ss:$6 sm:$0xff]  ;;  %296 = vst.msk [vmem:[#allocation2 + $0x2c8] sm:$0xff] %vm41_vm0, %v280_v17  ;;  %247 = vst.msk [vmem:[#allocation2 + $0x248] sm:$0xff] %vm41_vm0, %v231_v18  ;;  %v421_v22 = vld [vmem:[#allocation2 + $0x213] ss:$6 sm:$0xff] }
 0x128   :  { %v453_v23 = vld [vmem:[#allocation2 + $0x214] ss:$6 sm:$0xff]  ;;  %v485_v24 = vld [vmem:[#allocation2 + $0x215] ss:$6 sm:$0xff]  ;;  %v505_v25 = vmul.f32 %v421_v22, %v325_v19 }
 0x129   :  { %v521_v26 = vmul.f32 %v453_v23, %v357_v20  ;;  %v553_v30 = vmul.f32 %v485_v24, %v389_v21 }
 0x12a   :  { %v281_v27 = vpop.trf.xlu1  ;;  %v232_v28 = vpop.trf.xlu0 }
 0x12b   :  { %v537_v29 = vadd.f32 %v521_v26, %v505_v25  ;;  %297 = vst.msk [vmem:[#allocation2 + $0x2d0] sm:$0xff] %vm41_vm0, %v281_v27  ;;  %248 = vst.msk [vmem:[#allocation2 + $0x250] sm:$0xff] %vm41_vm0, %v232_v28 }
 0x12d   :  { %v569_v31 = vadd.f32 %v553_v30, %v537_v29 }
 0x12e   :  { %v282_v32 = vpop.trf.xlu1  ;;  %v233_v33 = vpop.trf.xlu0  ;;  %v331_v53 = vld [vmem:[#allocation2 + $0x2a0] ss:$6 sm:$0xff]  ;;  %v363_v54 = vld [vmem:[#allocation2 + $0x2a1] ss:$6 sm:$0xff] }
 0x12f   :  { %585 = vxpose.xlu0.b32.cont [12/16] (narrow) %v569_v31, 8  ;;  %298 = vst.msk [vmem:[#allocation2 + $0x2d8] sm:$0xff] %vm41_vm0, %v282_v32  ;;  %249 = vst.msk [vmem:[#allocation2 + $0x258] sm:$0xff] %vm41_vm0, %v233_v33  ;;  %v427_v55 = vld [vmem:[#allocation2 + $0x2a3] ss:$6 sm:$0xff] }
 0x130   :  { %v459_v56 = vld [vmem:[#allocation2 + $0x2a4] ss:$6 sm:$0xff]  ;;  %v508_v1 = vmul.f32 %v427_v55, %v331_v53  ;;  %v491_v10 = vld [vmem:[#allocation2 + $0x2a5] ss:$6 sm:$0xff] }
 0x131   :  { %v524_v2 = vmul.f32 %v459_v56, %v363_v54  ;;  %v395_v9 = vld [vmem:[#allocation2 + $0x2a2] ss:$6 sm:$0xff] }
 0x132   :  { %v283_v34 = vpop.trf.xlu1  ;;  %v234_v35 = vpop.trf.xlu0  ;;  %v556_v15 = vmul.f32 %v491_v10, %v395_v9 }
 0x133   :  { %299 = vst.msk [vmem:[#allocation2 + $0x2e0] sm:$0xff] %vm41_vm0, %v283_v34  ;;  %250 = vst.msk [vmem:[#allocation2 + $0x260] sm:$0xff] %vm41_vm0, %v234_v35  ;;  %v540_v12 = vadd.f32 %v524_v2, %v508_v1 }
 0x135   :  { %v572_v18 = vadd.f32 %v556_v15, %v540_v12 }
 0x136   :  { %v284_v36 = vpop.trf.xlu1  ;;  %v235_v37 = vpop.trf.xlu0 }
 0x137   :  { %300 = vst.msk [vmem:[#allocation2 + $0x2e8] sm:$0xff] %vm41_vm0, %v284_v36  ;;  %251 = vst.msk [vmem:[#allocation2 + $0x268] sm:$0xff] %vm41_vm0, %v235_v37 }
 0x13a   :  { %v285_v38 = vpop.trf.xlu1  ;;  %v236_v39 = vpop.trf.xlu0 }
 0x13b   :  { %301 = vst.msk [vmem:[#allocation2 + $0x2f0] sm:$0xff] %vm41_vm0, %v285_v38  ;;  %252 = vst.msk [vmem:[#allocation2 + $0x270] sm:$0xff] %vm41_vm0, %v236_v39 }
 0x13e   :  { %v286_v40 = vpop.trf.xlu1  ;;  %v237_v41 = vpop.trf.xlu0  ;;  %v327_v42 = vld [vmem:[#allocation2 + $0x240] ss:$6 sm:$0xff]  ;;  %v359_v43 = vld [vmem:[#allocation2 + $0x241] ss:$6 sm:$0xff] }
 0x13f   :  { %v391_v44 = vld [vmem:[#allocation2 + $0x242] ss:$6 sm:$0xff]  ;;  %302 = vst.msk [vmem:[#allocation2 + $0x2f8] sm:$0xff] %vm41_vm0, %v286_v40  ;;  %253 = vst.msk [vmem:[#allocation2 + $0x278] sm:$0xff] %vm41_vm0, %v237_v41  ;;  %v423_v45 = vld [vmem:[#allocation2 + $0x243] ss:$6 sm:$0xff] }
 0x140   :  { %v455_v46 = vld [vmem:[#allocation2 + $0x244] ss:$6 sm:$0xff]  ;;  %v487_v47 = vld [vmem:[#allocation2 + $0x245] ss:$6 sm:$0xff]  ;;  %v506_v48 = vmul.f32 %v423_v45, %v327_v42 }
 0x141   :  { %v522_v49 = vmul.f32 %v455_v46, %v359_v43  ;;  %v554_v51 = vmul.f32 %v487_v47, %v391_v44 }
 0x143   :  { %v538_v50 = vadd.f32 %v522_v49, %v506_v48 }
 0x145   :  { %v570_v52 = vadd.f32 %v554_v51, %v538_v50 }
 0x146   :  { %v329_v57 = vld [vmem:[#allocation2 + $0x270] ss:$6 sm:$0xff]  ;;  %v361_v58 = vld [vmem:[#allocation2 + $0x271] ss:$6 sm:$0xff] }
 0x147   :  { %586 = vxpose.xlu0.b32.cont [13/16] (narrow) %v570_v52, 8  ;;  %v393_v59 = vld [vmem:[#allocation2 + $0x272] ss:$6 sm:$0xff]  ;;  %v425_v60 = vld [vmem:[#allocation2 + $0x273] ss:$6 sm:$0xff] }
 0x148   :  { %v457_v61 = vld [vmem:[#allocation2 + $0x274] ss:$6 sm:$0xff]  ;;  %v489_v62 = vld [vmem:[#allocation2 + $0x275] ss:$6 sm:$0xff]  ;;  %v507_v63 = vmul.f32 %v425_v60, %v329_v57 }
 0x149   :  { %v523_v0 = vmul.f32 %v457_v61, %v361_v58  ;;  %v333_v3 = vld [vmem:[#allocation2 + $0x2d0] ss:$6 sm:$0xff]  ;;  %v365_v4 = vld [vmem:[#allocation2 + $0x2d1] ss:$6 sm:$0xff]  ;;  %v555_v8 = vmul.f32 %v489_v62, %v393_v59 }
 0x14a   :  { %v429_v5 = vld [vmem:[#allocation2 + $0x2d3] ss:$6 sm:$0xff]  ;;  %v461_v6 = vld [vmem:[#allocation2 + $0x2d4] ss:$6 sm:$0xff] }
 0x14b   :  { %v539_v7 = vadd.f32 %v523_v0, %v507_v63  ;;  %v509_v13 = vmul.f32 %v429_v5, %v333_v3  ;;  %v525_v14 = vmul.f32 %v461_v6, %v365_v4  ;;  %v397_v16 = vld [vmem:[#allocation2 + $0x2d2] ss:$6 sm:$0xff]  ;;  %v493_v17 = vld [vmem:[#allocation2 + $0x2d5] ss:$6 sm:$0xff] }
 0x14c   :  { %v557_v20 = vmul.f32 %v493_v17, %v397_v16 }
 0x14d   :  { %v571_v11 = vadd.f32 %v555_v8, %v539_v7  ;;  %v541_v19 = vadd.f32 %v525_v14, %v509_v13 }
 0x14f   :  { %587 = vxpose.xlu0.b32.cont [14/16] (narrow) %v571_v11, 8  ;;  %v573_v21 = vadd.f32 %v557_v20, %v541_v19 }
 0x153   :  { %588 = vxpose.xlu0.b32.cont [15/16] (narrow) %v572_v18, 8 }
 0x157   :  { %589 = vxpose.xlu0.b32.end [16/16] (narrow) %v573_v21, 8 }
 0x19b   :  { %v590_v22 = vpop.trf.xlu0 }
 0x19c   :  { %606 = vst [vmem:[%s740_s1] sm:$0xff] %v590_v22 }

</bundles_post_ra>
